<compile_context>
chip_gen: v5e
topology: v5e:2x2
jax: 0.10.0
libtpu: 0.0.40
codegen_flags: <defaults>
</compile_context>

<pallas_src>
import functools

import jax
import jax.numpy as jnp
from jax import lax
from jax.experimental import pallas as pl
from jax.experimental.pallas import tpu as pltpu


def _conv3x3_kernel(x_ref, w_ref, s_ref, b_ref, o_ref, *, KH, KW, Wp, Lw):
    """Processes B images per grid step.

    x_ref : (B, Cin, Limg)      flattened padded images (compute dtype)
    w_ref : (KH*KW, Cout, Cin)  per-tap weights         (compute dtype)   [resident]
    s_ref : (Lw, HW)            0/1 column-compaction selector (f32)      [resident]
    b_ref : (Cout, 1)           bias (f32)                                [resident]
    o_ref : (B, Cout, HW)       dense output block, HW = H*W
    """
    B = x_ref.shape[0]
    bias_v = b_ref[...]                              # (Cout, 1) f32, hoisted
    sel = s_ref[...]                                 # (Lw, HW)  f32, hoisted

    for b in range(B):                               # static unroll, B is small
        acc = None
        for kh in range(KH):
            for kw in range(KW):
                d = kh * Wp + kw                     # static flat tap offset
                xs = x_ref[b, :, pl.ds(d, Lw)]       # (Cin, Lw)
                w_tap = w_ref[kh * KW + kw]          # (Cout, Cin)
                t = jnp.dot(w_tap, xs, preferred_element_type=jnp.float32)
                acc = t if acc is None else acc + t  # (Cout, Lw) f32 accumulator in vregs
        # Drop the 2 junk columns per padded-width row: (Cout, Lw) @ (Lw, HW) -> dense.
        dense = jnp.dot(acc, sel, preferred_element_type=jnp.float32)
        o_ref[b] = (dense + bias_v).astype(o_ref.dtype)


def _pick_images_per_step(n, per_image_bytes, *, budget_bytes=12 << 20):
    """Largest divisor B of n keeping >=2 grid steps (when n>=2) within the VMEM budget."""
    best = 1
    for b in range(1, n + 1):
        if n % b:
            continue
        if n >= 2 and n // b < 2:
            continue        # keep >= 2 grid steps so both v7x TensorCores get work
        if b * per_image_bytes > budget_bytes:
            continue
        best = b
    return best


def conv_circular_pallas(x_nchw, weight, bias, *,
                         compute_dtype=jnp.bfloat16, out_dtype=jnp.float32):
    """x_nchw: (N, Cin, H, W); weight: (Cout, Cin, 3, 3); bias: (Cout,). Returns NCHW."""
    N, Cin, H, W = x_nchw.shape
    Cout, Cin_w, KH, KW = weight.shape
    assert Cin_w == Cin and (KH, KW) == (3, 3)

    Wp = W + 2                        # circularly padded width
    Lw = H * Wp                       # wide flat output length (incl. 2 junk cols / row)
    HW = H * W                        # dense output length (256 here: multiple of 128)
    Lp = (H + 2) * Wp                 # flattened padded image length
    Limg = Lp + (KW - 1)              # largest tap read is (Lw-1) + 2*Wp + 2 = Lp + 1

    # ---- glue (plain JAX): circular width pad + zero height pad + flatten ----
    xc = x_nchw.astype(compute_dtype)
    x_wpad = jnp.concatenate([xc[..., -1:], xc, xc[..., :1]], axis=-1)      # (N,Cin,H,Wp)
    x_pad = jnp.pad(x_wpad, ((0, 0), (0, 0), (1, 1), (0, 0)))               # (N,Cin,H+2,Wp)
    x_flat = jnp.pad(x_pad.reshape(N, Cin, Lp),
                     ((0, 0), (0, 0), (0, Limg - Lp)))                      # (N,Cin,Limg)

    # Per-tap weights (tap-major) and bias column.
    w_taps = jnp.transpose(weight, (2, 3, 0, 1)).reshape(KH * KW, Cout, Cin)
    w_taps = w_taps.astype(compute_dtype)
    b_col = bias.astype(jnp.float32).reshape(Cout, 1)

    # 0/1 selector: wide column h*Wp + w -> dense column h*W + w (only w < W kept).
    wide = jnp.arange(Lw)
    h_idx, w_idx = wide // Wp, wide % Wp
    sel = ((w_idx < W)[:, None]
           & ((h_idx * W + w_idx)[:, None] == jnp.arange(HW)[None, :])).astype(jnp.float32)

    per_image_bytes = 2 * (Cin * Limg * jnp.dtype(compute_dtype).itemsize
                           + Cout * HW * jnp.dtype(out_dtype).itemsize)     # double-buffered
    B = _pick_images_per_step(N, per_image_bytes)

    kernel = functools.partial(_conv3x3_kernel, KH=KH, KW=KW, Wp=Wp, Lw=Lw)

    out_flat = pl.pallas_call(
        kernel,
        out_shape=jax.ShapeDtypeStruct((N, Cout, HW), out_dtype),
        grid=(N // B,),
        in_specs=[
            pl.BlockSpec((B, Cin, Limg), lambda n: (n, 0, 0)),
            pl.BlockSpec((KH * KW, Cout, Cin), lambda n: (0, 0, 0)),   # resident
            pl.BlockSpec((Lw, HW), lambda n: (0, 0)),                  # resident
            pl.BlockSpec((Cout, 1), lambda n: (0, 0)),                 # resident
        ],
        out_specs=pl.BlockSpec((B, Cout, HW), lambda n: (n, 0, 0)),
        compiler_params=pltpu.CompilerParams(
            dimension_semantics=("parallel",),
            vmem_limit_bytes=32 * 1024 * 1024,
        ),
    )(x_flat, w_taps, sel, b_col)

    # HW lanes are already dense and ordered: reshape to NCHW is free metadata.
    return out_flat.reshape(N, Cout, H, W)


def _reference(x_nchw, weight, bias):
    """Pure-JAX (f32) reference of the PyTorch forward."""
    x_wpad = jnp.concatenate([x_nchw[..., -1:], x_nchw, x_nchw[..., :1]], axis=-1)
    out = lax.conv_general_dilated(
        x_wpad, weight, window_strides=(1, 1),
        padding=((1, 1), (0, 0)),
        dimension_numbers=("NCHW", "OIHW", "NCHW"),
    )
    return out + bias.reshape(1, -1, 1, 1)


if __name__ == "__main__":
    # Small shapes consistent with the module (scaled-down in_ch/out_ch).
    N, Cin, H, W = 2, 4, 16, 16
    Cout, KH, KW = 8, 3, 3

    key = jax.random.PRNGKey(0)
    kx, kw_, kb = jax.random.split(key, 3)

    x = jax.random.normal(kx, (N, Cin, H, W), dtype=jnp.float32)

    # torch Conv2d default init: U(-1/sqrt(fan_in), 1/sqrt(fan_in))
    fan_in = Cin * KH * KW
    bound = 1.0 / (fan_in ** 0.5)
    weight = jax.random.uniform(kw_, (Cout, Cin, KH, KW), jnp.float32, -bound, bound)
    bias = jax.random.uniform(kb, (Cout,), jnp.float32, -bound, bound)

    out = conv_circular_pallas(x, weight, bias)
    out = jax.block_until_ready(out)
    assert out.shape == (N, Cout, H, W), out.shape

    # Tight check: reference fed the same bf16-rounded inputs (isolates summation order +
    # the in-kernel f32 compaction matmul).
    xq = x.astype(jnp.bfloat16).astype(jnp.float32)
    wq = weight.astype(jnp.bfloat16).astype(jnp.float32)
    ref_q = _reference(xq, wq, bias)
    assert jnp.allclose(out, ref_q, atol=2e-3, rtol=2e-3), float(jnp.max(jnp.abs(out - ref_q)))

    # Loose sanity check vs. the full-f32 reference (difference = bf16 input rounding only).
    ref = _reference(x, weight, bias)
    assert jnp.allclose(out, ref, atol=5e-2, rtol=5e-2), float(jnp.max(jnp.abs(out - ref)))

    print("KERNEL_OK")
</pallas_src>

<mosaic_0001>
module attributes {stable_mosaic.version = 11 : i64} {
  func.func @_conv3x3_kernel(%arg0: i32, %arg1: memref<1x4x326xbf16, #tpu.memory_space<vmem>>, %arg2: memref<9x8x4xbf16, #tpu.memory_space<vmem>>, %arg3: memref<288x256xf32, #tpu.memory_space<vmem>>, %arg4: memref<8x1xf32, #tpu.memory_space<vmem>>, %arg5: memref<1x8x256xf32, #tpu.memory_space<vmem>>) attributes {dimension_semantics = [#tpu.dimension_semantics<parallel>], iteration_bounds = array<i64: 2>, scalar_prefetch = 0 : i64, scratch_operands = 0 : i64, tpu.core_type = #tpu.core_type<tc>, window_params = [{transform_indices = @transform_0, window_bounds = array<i64: 1, 4, 326>}, {pipeline_mode = #tpu.pipeline_mode<synchronous>, transform_indices = @transform_1, window_bounds = array<i64: 9, 8, 4>}, {pipeline_mode = #tpu.pipeline_mode<synchronous>, transform_indices = @transform_2, window_bounds = array<i64: 288, 256>}, {pipeline_mode = #tpu.pipeline_mode<synchronous>, transform_indices = @transform_3, window_bounds = array<i64: 8, 1>}, {transform_indices = @transform_4, window_bounds = array<i64: 1, 8, 256>}]} {
    %c0 = arith.constant 0 : index
    %c0_0 = arith.constant 0 : index
    %0 = vector.load %arg4[%c0, %c0_0] : memref<8x1xf32, #tpu.memory_space<vmem>>, vector<8x1xf32>
    %c0_1 = arith.constant 0 : index
    %c0_2 = arith.constant 0 : index
    %1 = vector.load %arg3[%c0_1, %c0_2] : memref<288x256xf32, #tpu.memory_space<vmem>>, vector<288x256xf32>
    %c0_3 = arith.constant 0 : index
    %c0_4 = arith.constant 0 : index
    %c0_5 = arith.constant 0 : index
    %2 = vector.load %arg1[%c0_3, %c0_4, %c0_5] : memref<1x4x326xbf16, #tpu.memory_space<vmem>>, vector<1x4x288xbf16>
    %3 = vector.shape_cast %2 : vector<1x4x288xbf16> to vector<4x288xbf16>
    %c0_6 = arith.constant 0 : index
    %c0_7 = arith.constant 0 : index
    %c0_8 = arith.constant 0 : index
    %4 = vector.load %arg2[%c0_6, %c0_7, %c0_8] : memref<9x8x4xbf16, #tpu.memory_space<vmem>>, vector<1x8x4xbf16>
    %5 = vector.shape_cast %4 : vector<1x8x4xbf16> to vector<8x4xbf16>
    %cst = arith.constant dense<0.000000e+00> : vector<8x288xf32>
    %6 = tpu.matmul %5, %3, %cst {dimension_numbers = #tpu.dot_dimension_numbers<[1], [0], [0], [1], [0, 0, 1, 1], [], []>} : vector<8x4xbf16>, vector<4x288xbf16>, vector<8x288xf32> -> vector<8x288xf32>
    %c0_9 = arith.constant 0 : index
    %c0_10 = arith.constant 0 : index
    %c1 = arith.constant 1 : index
    %7 = vector.load %arg1[%c0_9, %c0_10, %c1] : memref<1x4x326xbf16, #tpu.memory_space<vmem>>, vector<1x4x288xbf16>
    %8 = vector.shape_cast %7 : vector<1x4x288xbf16> to vector<4x288xbf16>
    %c1_11 = arith.constant 1 : index
    %c0_12 = arith.constant 0 : index
    %c0_13 = arith.constant 0 : index
    %9 = vector.load %arg2[%c1_11, %c0_12, %c0_13] : memref<9x8x4xbf16, #tpu.memory_space<vmem>>, vector<1x8x4xbf16>
    %10 = vector.shape_cast %9 : vector<1x8x4xbf16> to vector<8x4xbf16>
    %cst_14 = arith.constant dense<0.000000e+00> : vector<8x288xf32>
    %11 = tpu.matmul %10, %8, %cst_14 {dimension_numbers = #tpu.dot_dimension_numbers<[1], [0], [0], [1], [0, 0, 1, 1], [], []>} : vector<8x4xbf16>, vector<4x288xbf16>, vector<8x288xf32> -> vector<8x288xf32>
    %12 = arith.addf %6, %11 : vector<8x288xf32>
    %c0_15 = arith.constant 0 : index
    %c0_16 = arith.constant 0 : index
    %c2 = arith.constant 2 : index
    %13 = vector.load %arg1[%c0_15, %c0_16, %c2] : memref<1x4x326xbf16, #tpu.memory_space<vmem>>, vector<1x4x288xbf16>
    %14 = vector.shape_cast %13 : vector<1x4x288xbf16> to vector<4x288xbf16>
    %c2_17 = arith.constant 2 : index
    %c0_18 = arith.constant 0 : index
    %c0_19 = arith.constant 0 : index
    %15 = vector.load %arg2[%c2_17, %c0_18, %c0_19] : memref<9x8x4xbf16, #tpu.memory_space<vmem>>, vector<1x8x4xbf16>
    %16 = vector.shape_cast %15 : vector<1x8x4xbf16> to vector<8x4xbf16>
    %cst_20 = arith.constant dense<0.000000e+00> : vector<8x288xf32>
    %17 = tpu.matmul %16, %14, %cst_20 {dimension_numbers = #tpu.dot_dimension_numbers<[1], [0], [0], [1], [0, 0, 1, 1], [], []>} : vector<8x4xbf16>, vector<4x288xbf16>, vector<8x288xf32> -> vector<8x288xf32>
    %18 = arith.addf %12, %17 : vector<8x288xf32>
    %c0_21 = arith.constant 0 : index
    %c0_22 = arith.constant 0 : index
    %c18 = arith.constant 18 : index
    %19 = vector.load %arg1[%c0_21, %c0_22, %c18] : memref<1x4x326xbf16, #tpu.memory_space<vmem>>, vector<1x4x288xbf16>
    %20 = vector.shape_cast %19 : vector<1x4x288xbf16> to vector<4x288xbf16>
    %c3 = arith.constant 3 : index
    %c0_23 = arith.constant 0 : index
    %c0_24 = arith.constant 0 : index
    %21 = vector.load %arg2[%c3, %c0_23, %c0_24] : memref<9x8x4xbf16, #tpu.memory_space<vmem>>, vector<1x8x4xbf16>
    %22 = vector.shape_cast %21 : vector<1x8x4xbf16> to vector<8x4xbf16>
    %cst_25 = arith.constant dense<0.000000e+00> : vector<8x288xf32>
    %23 = tpu.matmul %22, %20, %cst_25 {dimension_numbers = #tpu.dot_dimension_numbers<[1], [0], [0], [1], [0, 0, 1, 1], [], []>} : vector<8x4xbf16>, vector<4x288xbf16>, vector<8x288xf32> -> vector<8x288xf32>
    %24 = arith.addf %18, %23 : vector<8x288xf32>
    %c0_26 = arith.constant 0 : index
    %c0_27 = arith.constant 0 : index
    %c19 = arith.constant 19 : index
    %25 = vector.load %arg1[%c0_26, %c0_27, %c19] : memref<1x4x326xbf16, #tpu.memory_space<vmem>>, vector<1x4x288xbf16>
    %26 = vector.shape_cast %25 : vector<1x4x288xbf16> to vector<4x288xbf16>
    %c4 = arith.constant 4 : index
    %c0_28 = arith.constant 0 : index
    %c0_29 = arith.constant 0 : index
    %27 = vector.load %arg2[%c4, %c0_28, %c0_29] : memref<9x8x4xbf16, #tpu.memory_space<vmem>>, vector<1x8x4xbf16>
    %28 = vector.shape_cast %27 : vector<1x8x4xbf16> to vector<8x4xbf16>
    %cst_30 = arith.constant dense<0.000000e+00> : vector<8x288xf32>
    %29 = tpu.matmul %28, %26, %cst_30 {dimension_numbers = #tpu.dot_dimension_numbers<[1], [0], [0], [1], [0, 0, 1, 1], [], []>} : vector<8x4xbf16>, vector<4x288xbf16>, vector<8x288xf32> -> vector<8x288xf32>
    %30 = arith.addf %24, %29 : vector<8x288xf32>
    %c0_31 = arith.constant 0 : index
    %c0_32 = arith.constant 0 : index
    %c20 = arith.constant 20 : index
    %31 = vector.load %arg1[%c0_31, %c0_32, %c20] : memref<1x4x326xbf16, #tpu.memory_space<vmem>>, vector<1x4x288xbf16>
    %32 = vector.shape_cast %31 : vector<1x4x288xbf16> to vector<4x288xbf16>
    %c5 = arith.constant 5 : index
    %c0_33 = arith.constant 0 : index
    %c0_34 = arith.constant 0 : index
    %33 = vector.load %arg2[%c5, %c0_33, %c0_34] : memref<9x8x4xbf16, #tpu.memory_space<vmem>>, vector<1x8x4xbf16>
    %34 = vector.shape_cast %33 : vector<1x8x4xbf16> to vector<8x4xbf16>
    %cst_35 = arith.constant dense<0.000000e+00> : vector<8x288xf32>
    %35 = tpu.matmul %34, %32, %cst_35 {dimension_numbers = #tpu.dot_dimension_numbers<[1], [0], [0], [1], [0, 0, 1, 1], [], []>} : vector<8x4xbf16>, vector<4x288xbf16>, vector<8x288xf32> -> vector<8x288xf32>
    %36 = arith.addf %30, %35 : vector<8x288xf32>
    %c0_36 = arith.constant 0 : index
    %c0_37 = arith.constant 0 : index
    %c36 = arith.constant 36 : index
    %37 = vector.load %arg1[%c0_36, %c0_37, %c36] : memref<1x4x326xbf16, #tpu.memory_space<vmem>>, vector<1x4x288xbf16>
    %38 = vector.shape_cast %37 : vector<1x4x288xbf16> to vector<4x288xbf16>
    %c6 = arith.constant 6 : index
    %c0_38 = arith.constant 0 : index
    %c0_39 = arith.constant 0 : index
    %39 = vector.load %arg2[%c6, %c0_38, %c0_39] : memref<9x8x4xbf16, #tpu.memory_space<vmem>>, vector<1x8x4xbf16>
    %40 = vector.shape_cast %39 : vector<1x8x4xbf16> to vector<8x4xbf16>
    %cst_40 = arith.constant dense<0.000000e+00> : vector<8x288xf32>
    %41 = tpu.matmul %40, %38, %cst_40 {dimension_numbers = #tpu.dot_dimension_numbers<[1], [0], [0], [1], [0, 0, 1, 1], [], []>} : vector<8x4xbf16>, vector<4x288xbf16>, vector<8x288xf32> -> vector<8x288xf32>
    %42 = arith.addf %36, %41 : vector<8x288xf32>
    %c0_41 = arith.constant 0 : index
    %c0_42 = arith.constant 0 : index
    %c37 = arith.constant 37 : index
    %43 = vector.load %arg1[%c0_41, %c0_42, %c37] : memref<1x4x326xbf16, #tpu.memory_space<vmem>>, vector<1x4x288xbf16>
    %44 = vector.shape_cast %43 : vector<1x4x288xbf16> to vector<4x288xbf16>
    %c7 = arith.constant 7 : index
    %c0_43 = arith.constant 0 : index
    %c0_44 = arith.constant 0 : index
    %45 = vector.load %arg2[%c7, %c0_43, %c0_44] : memref<9x8x4xbf16, #tpu.memory_space<vmem>>, vector<1x8x4xbf16>
    %46 = vector.shape_cast %45 : vector<1x8x4xbf16> to vector<8x4xbf16>
    %cst_45 = arith.constant dense<0.000000e+00> : vector<8x288xf32>
    %47 = tpu.matmul %46, %44, %cst_45 {dimension_numbers = #tpu.dot_dimension_numbers<[1], [0], [0], [1], [0, 0, 1, 1], [], []>} : vector<8x4xbf16>, vector<4x288xbf16>, vector<8x288xf32> -> vector<8x288xf32>
    %48 = arith.addf %42, %47 : vector<8x288xf32>
    %c0_46 = arith.constant 0 : index
    %c0_47 = arith.constant 0 : index
    %c38 = arith.constant 38 : index
    %49 = vector.load %arg1[%c0_46, %c0_47, %c38] : memref<1x4x326xbf16, #tpu.memory_space<vmem>>, vector<1x4x288xbf16>
    %50 = vector.shape_cast %49 : vector<1x4x288xbf16> to vector<4x288xbf16>
    %c8 = arith.constant 8 : index
    %c0_48 = arith.constant 0 : index
    %c0_49 = arith.constant 0 : index
    %51 = vector.load %arg2[%c8, %c0_48, %c0_49] : memref<9x8x4xbf16, #tpu.memory_space<vmem>>, vector<1x8x4xbf16>
    %52 = vector.shape_cast %51 : vector<1x8x4xbf16> to vector<8x4xbf16>
    %cst_50 = arith.constant dense<0.000000e+00> : vector<8x288xf32>
    %53 = tpu.matmul %52, %50, %cst_50 {dimension_numbers = #tpu.dot_dimension_numbers<[1], [0], [0], [1], [0, 0, 1, 1], [], []>} : vector<8x4xbf16>, vector<4x288xbf16>, vector<8x288xf32> -> vector<8x288xf32>
    %54 = arith.addf %48, %53 : vector<8x288xf32>
    %cst_51 = arith.constant dense<0.000000e+00> : vector<8x256xf32>
    %55 = tpu.matmul %54, %1, %cst_51 {dimension_numbers = #tpu.dot_dimension_numbers<[1], [0], [0], [1], [0, 0, 1, 1], [], []>} : vector<8x288xf32>, vector<288x256xf32>, vector<8x256xf32> -> vector<8x256xf32>
    %56 = vector.broadcast %0 : vector<8x1xf32> to vector<8x256xf32>
    %57 = arith.addf %55, %56 : vector<8x256xf32>
    %c0_52 = arith.constant 0 : index
    %c0_53 = arith.constant 0 : index
    %c0_54 = arith.constant 0 : index
    %58 = vector.load %arg5[%c0_52, %c0_53, %c0_54] : memref<1x8x256xf32, #tpu.memory_space<vmem>>, vector<1x8x256xf32>
    %59 = vector.shape_cast %58 : vector<1x8x256xf32> to vector<8x256xf32>
    %60 = vector.shape_cast %57 : vector<8x256xf32> to vector<1x8x256xf32>
    tpu.vector_store %arg5[%c0_52, %c0_53, %c0_54], %60 {strides = array<i32>} : memref<1x8x256xf32, #tpu.memory_space<vmem>>, vector<1x8x256xf32>,
    return
  }
  func.func @transform_0(%arg0: i32) -> (i32, i32, i32) {
    %c0_i32 = arith.constant 0 : i32
    %c0_i32_0 = arith.constant 0 : i32
    %c0_i32_1 = arith.constant 0 : i32
    return %arg0, %c0_i32, %c0_i32_0 : i32, i32, i32
  }
  func.func @transform_1(%arg0: i32) -> (i32, i32, i32) {
    %c0_i32 = arith.constant 0 : i32
    %c0_i32_0 = arith.constant 0 : i32
    %c0_i32_1 = arith.constant 0 : i32
    %c0_i32_2 = arith.constant 0 : i32
    return %c0_i32, %c0_i32_0, %c0_i32_1 : i32, i32, i32
  }
  func.func @transform_2(%arg0: i32) -> (i32, i32) {
    %c0_i32 = arith.constant 0 : i32
    %c0_i32_0 = arith.constant 0 : i32
    %c0_i32_1 = arith.constant 0 : i32
    return %c0_i32, %c0_i32_0 : i32, i32
  }
  func.func @transform_3(%arg0: i32) -> (i32, i32) {
    %c0_i32 = arith.constant 0 : i32
    %c0_i32_0 = arith.constant 0 : i32
    %c0_i32_1 = arith.constant 0 : i32
    return %c0_i32, %c0_i32_0 : i32, i32
  }
  func.func @transform_4(%arg0: i32) -> (i32, i32, i32) {
    %c0_i32 = arith.constant 0 : i32
    %c0_i32_0 = arith.constant 0 : i32
    %c0_i32_1 = arith.constant 0 : i32
    return %arg0, %c0_i32, %c0_i32_0 : i32, i32, i32
  }
}

</mosaic_0001>

<bundles_post_ra>
// kernel: tpu_custom_call.1
= control target key start
LH: loop header
LB: loop body
LE: loop exit
PB: predicated region body
PF: predicated region fallthrough
CT: control target
= control target key end

     0   :  { %9 = vsyncpa [#allocation3], 0  ;;  %s1629_s0 = inlined_call_operand.vmem [shape: bf16[2,4,326], index: 0, kind: input, shape index: {}]   ;;  %s1630_s1 = inlined_call_operand.vmem [shape: bf16[9,8,4], index: 1, kind: input, shape index: {}]   ;;  %s1631_s2 = inlined_call_operand.hbm [shape: f32[288,256], index: 2, kind: input, shape index: {}]   ;;  %s1632_s3 = inlined_call_operand.vmem [shape: f32[8,1], index: 3, kind: input, shape index: {}]   ;;  %s1633_s4 = inlined_call_operand.hbm [shape: f32[2,8,256], index: 4, kind: output, shape index: {}]  }
   0x1   :  { %10 = vsyncpa [#allocation4], 0 }
   0x2   :  { %12 = vsyncpa [#allocation4 + $0x1], 0  ;;  %s1399_s15 = smov 0   ;;  %s1401_s16 = smov 0  }
   0x3   :  { %s1403_s17 = smov 0   ;;  %s1405_s18 = smov 0  }
   0x4 LB: > { %s1420_s19 = sadd.s32 4294967295, %s1360_s18   ;;  %s1150_s20 = sadd.s32 4294967294, %s1360_s18   ;;  %s1360_s18 = sphi %s1405_s18, %s1639_s18   ;;  %s1356_s17 = sphi %s1403_s17, %s1638_s17   ;;  %s1352_s16 = sphi %s1401_s16, %s1637_s16   ;;  %s1348_s15 = sphi %s1399_s15, %s1636_s15  }
   0x5   : > { %s1424_s21 = sadd.s32 1, %s1360_s18   ;;  %s114_s22 = sadd.s32 1, %s1356_s17 }
   0x6   : > { %s111_s23 = ssub.s32 %s1360_s18, %s1424_s21  ;;  %p124_p0 = scmp.ne.s32.totalorder %s1356_s17, %s1352_s16 }
   0x7   : > { %p112_p1 = scmp.eq.s32.totalorder %s111_s23, 0  ;;  %p125_p2 = scmp.eq.s32.totalorder %s1420_s19, 1 }
   0x8   : > { %p130_p3 = scmp.ne.s32.totalorder %s1352_s16, %s1348_s15  ;;  %p131_p4 = scmp.eq.s32.totalorder %s1150_s20, 1 }
   0x9   : > { %s1435_s24 = scalar_select %p112_p1, %s1356_s17, %s114_s22  }
   0xa   : > { %p1437_p5 = por %p125_p2, %p124_p0  ;;  %p1441_p6 = por %p131_p4, %p130_p3 }
   0xb   : > { %p1151_p7 = scmp.ge.s32.totalorder %s1360_s18, 1  ;;  %p138_p8 = scmp.lt.s32.totalorder %s1360_s18, 3 }
   0xc   : > { %p1216_p9 = scmp.eq.s32.totalorder %s1420_s19, 0  ;;  %s152_s29 = sshll.u32 %s1631_s2, 4  ;;  %s153_s29 = int_to_ptr.hbm [resolvable:$true] %s152_s29 }
   0xd   : > { %p139_p10 = pnand %p1151_p7, %p138_p8  ;;  %s1362_s30 = smov [#allocation2]  }
   0xe   : > { %s154_s5 = sshll.u32 %s1362_s30, 4  ;;  %s1363_s6 = smov 256   ;;  %s155_s5 = int_to_ptr.vmem [resolvable:$true] %s154_s5 }
   0xf   : > { %p1208_p11 = pneg %p139_p10  ;;  %s1364_s7 = smov 16  }
  0x10   : > { %181 = sbr.rel (%p139_p10) target bundleno = 543 (0x21f), region = 36 }
  0x11   : > { %p1209_p12 = pnand %p1216_p9, %p1208_p11 }
  0x13   : > { %1211 = dma.hbm_to_vmem [thread:$0]  (!%p1209_p12), %s153_s29, 9216, %s155_s5, [#allocation3], %s1363_s6, %s1363_s6, %s1364_s7  }
  0x15   : > { %1339 = dma.done.wait (%p1216_p9), [#allocation3], 9216  }
  0x16   : > { %1341 = vsyncadd (%p1216_p9), [#allocation3], 4294958080  ;;  %p208_p13 = scmp.lt.s32.totalorder %s1420_s19, 1  ;;  %s1365_s13 = smov 127   ;;  %vm312_vm0 = vcmask 1041408   ;;  %vm308_vm1 = vcmask 31744  }
  0x17   : > { %s1366_s14 = smov 126   ;;  %s1367_s20 = smov 110   ;;  %v288_v36 = vld [vmem:[%s1630_s1] sm:$0xf]  ;;  %v1158_v41 = vld [vmem:[%s1630_s1 + $0x4] sm:$0xf] }
  0x18   : > { %s209_s8 = scalar_select %p208_p13, %s1420_s19, 1  ;;  %vm430_vm2 = vcmask 1031168   ;;  %vm305_vm3 = vcmask 1039360   ;;  %v1165_v46 = vld [vmem:[%s1630_s1 + $0x8] sm:$0xf]  ;;  %vm504_vm4 = vcmask 900096  }
  0x19   : > { %s1368_s22 = smov 109   ;;  %s1369_s23 = smov 108   ;;  %vm578_vm5 = vcmask 891904   ;;  %vm652_vm6 = vcmask 883712   ;;  %vm726_vm7 = vcmask 752640   ;;  %vm800_vm8 = vcmask 744448  }
  0x1a   : > { %s1201_s9 = smul.u32 6, %s209_s8  ;;  %s1370_s27 = smov 92   ;;  %vm874_vm9 = vcmask 736256   ;;  %vm936_vm10 = vcmask 261120  }
  0x1b   : > { %s1371_s28 = smov 91   ;;  %s1372_s29 = smov 90  }
  0x1c   : > { %s1462_s12 = scalar_lea.vmem %s1629_s0, %s1201_s9  ;;  %s205_s7 = sand.u32 1, %s1352_s16  }
  0x1d   : > { %v287_v0 = vld [vmem:[%s1462_s12] sm:$0x3f]  ;;  %s1156_s8 = sshll.u32 %s205_s7, 4  ;;  %s1200_s9 = sshll.u32 %s1420_s19, 4 }
  0x1e   : > { %292 = vst [vmem:[#allocation1] ss:$4 sm:$0xff] %v287_v0  ;;  %v413_v4 = vld [vmem:[%s1462_s12] sm:$0x3f]  ;;  %s207_s10 = scalar_lea.vmem [#allocation5], %s1156_s8 }
  0x1f   : > { %v487_v8 = vld [vmem:[%s1462_s12] sm:$0x3f] }
  0x20   : > { %v561_v12 = vld [vmem:[%s1462_s12] sm:$0x3f] }
  0x21   : > { %v635_v16 = vld [vmem:[%s1462_s12] sm:$0x3f] }
  0x22   : > { %v709_v20 = vld [vmem:[%s1462_s12] sm:$0x3f] }
  0x23   : > { %v783_v24 = vld [vmem:[%s1462_s12] sm:$0x3f] }
  0x24   : > { %v857_v28 = vld [vmem:[%s1462_s12] sm:$0x3f] }
  0x25   : > { %v293_v1 = vld.sshfl [vmem:[#allocation1] sm:$0xff pattern:$0x73625140]  ;;  %v297_v2 = vld.sshfl [vmem:[#allocation1 + $0x10] sm:$0xff pattern:$0x73625140] }
  0x26   : > { %299 = vrot.lane.b32.xlu0 %v293_v1, %s1365_s13  ;;  %303 = vrot.lane.b32.xlu1 %v297_v2, %s1365_s13  ;;  %v295_v3 = vld.sshfl [vmem:[#allocation1 + $0x8] sm:$0xff pattern:$0x73625140] }
  0x27   : > { %361 = vst [vmem:[#allocation1] ss:$4 sm:$0xff] %v287_v0 }
  0x2e   : > { %301 = vrot.lane.b32.xlu0 %v295_v3, %s1365_s13  ;;  %v1466_v5 = vld.sshfl [vmem:[#allocation1] sm:$0xff pattern:$0x73625140]  ;;  %v1468_v6 = vld.sshfl [vmem:[#allocation1 + $0x8] sm:$0xff pattern:$0x73625140]  ;;  %s1074_s13 = scalar_lea.hbm %s1633_s4, %s1200_s9 }
  0x2f   : > { %v1470_v7 = vld.sshfl [vmem:[#allocation1 + $0x10] sm:$0xff pattern:$0x73625140]  ;;  %v368_v35 = vsel %vm312_vm0, %v1466_v5, 0  ;;  %v370_v49 = vsel %vm312_vm0, %v1468_v6, 0 }
  0x30   : > { %417 = vst [vmem:[#allocation1] ss:$4 sm:$0xff] %v413_v4  ;;  %381 = vmatpush.bf16.msra.mxu3 %v368_v35  ;;  %v372_v50 = vsel %vm312_vm0, %v1470_v7, 0  ;;  %v1169_v3 = vld [vmem:[%s1630_s1 + $0xc] sm:$0xf] }
  0x33   : > { %1162 = vmatmul.msk.bf16.vlgmr.msra.gmra.mxu3 %vm308_vm1, %v288_v36 }
  0x37   : > { %v422_v9 = vld.sshfl [vmem:[#allocation1 + $0x10] sm:$0xff pattern:$0x73625140]  ;;  %v418_v10 = vld.sshfl [vmem:[#allocation1] sm:$0xff pattern:$0x73625140] }
  0x38   : > { %424 = vrot.lane.b32.xlu1 %v418_v10, %s1366_s14  ;;  %v420_v11 = vld.sshfl [vmem:[#allocation1 + $0x8] sm:$0xff pattern:$0x73625140] }
  0x39   : > { %426 = vrot.lane.b32.xlu2 %v420_v11, %s1366_s14  ;;  %491 = vst [vmem:[#allocation1] ss:$4 sm:$0xff] %v487_v8 }
  0x40   : > { %v492_v13 = vld.sshfl [vmem:[#allocation1] sm:$0xff pattern:$0x73625140]  ;;  %v496_v14 = vld.sshfl [vmem:[#allocation1 + $0x10] sm:$0xff pattern:$0x73625140] }
  0x41   : > { %502 = vrot.lane.b32.xlu1 %v496_v14, %s1367_s20  ;;  %v494_v15 = vld.sshfl [vmem:[#allocation1 + $0x8] sm:$0xff pattern:$0x73625140]  ;;  %428 = vrot.lane.b32.xlu2 %v422_v9, %s1366_s14  ;;  %s1076_s14 = sshll.u32 %s207_s10, 4  ;;  %s1077_s14 = int_to_ptr.vmem [resolvable:$true] %s1076_s14 }
  0x42   : > { %500 = vrot.lane.b32.xlu0 %v494_v15, %s1367_s20  ;;  %565 = vst [vmem:[#allocation1] ss:$4 sm:$0xff] %v561_v12 }
  0x49   : > { %v570_v17 = vld.sshfl [vmem:[#allocation1 + $0x10] sm:$0xff pattern:$0x73625140]  ;;  %v568_v18 = vld.sshfl [vmem:[#allocation1 + $0x8] sm:$0xff pattern:$0x73625140]  ;;  %498 = vrot.lane.b32.xlu2 %v492_v13, %s1367_s20 }
  0x4a   : > { %574 = vrot.lane.b32.xlu1 %v568_v18, %s1368_s22  ;;  %v566_v19 = vld.sshfl [vmem:[#allocation1] sm:$0xff pattern:$0x73625140]  ;;  %v1177_v18 = vld [vmem:[%s1630_s1 + $0x14] sm:$0xf]  ;;  %s1078_s20 = sshll.u32 %s1074_s13, 4  ;;  %s1079_s20 = int_to_ptr.hbm [resolvable:$true] %s1078_s20 }
  0x4b   : > { %572 = vrot.lane.b32.xlu0 %v566_v19, %s1368_s22  ;;  %639 = vst [vmem:[#allocation1] ss:$4 sm:$0xff] %v635_v16  ;;  %s1308_s19 = sshra.s32 %s1079_s20, 4  ;;  %s1309_s19 = int_to_ptr.hbm [resolvable:$true] %s1308_s19 }
  0x4c   : > { %p1315_p3 = scmp.lt.s32.totalorder %s1309_s19, %s1633_s4 }
  0x51   : > { %576 = vrot.lane.b32.xlu2 %v570_v17, %s1368_s22  ;;  %s1063_s22 = scalar_lea.sflag [#allocation4], %s205_s7 }
  0x52   : > { %v644_v21 = vld.sshfl [vmem:[#allocation1 + $0x10] sm:$0xff pattern:$0x73625140]  ;;  %v642_v22 = vld.sshfl [vmem:[#allocation1 + $0x8] sm:$0xff pattern:$0x73625140] }
  0x53   : > { %648 = vrot.lane.b32.xlu1 %v642_v22, %s1369_s23  ;;  %v640_v23 = vld.sshfl [vmem:[#allocation1] sm:$0xff pattern:$0x73625140] }
  0x54   : > { %646 = vrot.lane.b32.xlu0 %v640_v23, %s1369_s23  ;;  %713 = vst [vmem:[#allocation1] ss:$4 sm:$0xff] %v709_v20  ;;  %v1173_v20 = vld [vmem:[%s1630_s1 + $0x10] sm:$0xf] }
  0x59   : > { %650 = vrot.lane.b32.xlu2 %v644_v21, %s1369_s23  ;;  %s1310_s23 = scalar_lea.hbm %s1309_s19, 16 }
  0x5a   : > { %p1311_p0 = scmp.ne.s32.totalorder %s1309_s19, %s1310_s23 }
  0x5b   : > { %v718_v25 = vld.sshfl [vmem:[#allocation1 + $0x10] sm:$0xff pattern:$0x73625140]  ;;  %v716_v26 = vld.sshfl [vmem:[#allocation1 + $0x8] sm:$0xff pattern:$0x73625140] }
  0x5c   : > { %722 = vrot.lane.b32.xlu1 %v716_v26, %s1370_s27  ;;  %v714_v27 = vld.sshfl [vmem:[#allocation1] sm:$0xff pattern:$0x73625140]  ;;  %p1312_p1 = pnand %p1311_p0, %p1437_p5 }
  0x5d   : > { %720 = vrot.lane.b32.xlu0 %v714_v27, %s1370_s27  ;;  %787 = vst [vmem:[#allocation1] ss:$4 sm:$0xff] %v783_v24 }
  0x5e   : > { %p1313_p2 = pneg %p1312_p1 }
  0x61   : > { %724 = vrot.lane.b32.xlu2 %v718_v25, %s1370_s27 }
  0x64   : > { %v788_v29 = vld.sshfl [vmem:[#allocation1] sm:$0xff pattern:$0x73625140]  ;;  %v792_v30 = vld.sshfl [vmem:[#allocation1 + $0x10] sm:$0xff pattern:$0x73625140] }
  0x65   : > { %798 = vrot.lane.b32.xlu1 %v792_v30, %s1371_s28  ;;  %v790_v31 = vld.sshfl [vmem:[#allocation1 + $0x8] sm:$0xff pattern:$0x73625140] }
  0x66   : > { %796 = vrot.lane.b32.xlu0 %v790_v31, %s1371_s28  ;;  %861 = vst [vmem:[#allocation1] ss:$4 sm:$0xff] %v857_v28 }
  0x69   : > { %794 = vrot.lane.b32.xlu2 %v788_v29, %s1371_s28 }
  0x6d   : > { %v864_v32 = vld.sshfl [vmem:[#allocation1 + $0x8] sm:$0xff pattern:$0x73625140]  ;;  %v862_v33 = vld.sshfl [vmem:[#allocation1] sm:$0xff pattern:$0x73625140] }
  0x6e   : > { %870 = vrot.lane.b32.xlu1 %v864_v32, %s1372_s29  ;;  %868 = vrot.lane.b32.xlu0 %v862_v33, %s1372_s29  ;;  %v866_v34 = vld.sshfl [vmem:[#allocation1 + $0x10] sm:$0xff pattern:$0x73625140] }
  0x71   : > { %872 = vrot.lane.b32.xlu2 %v866_v34, %s1372_s29  ;;  %s1314_s29 = scalar_lea.hbm %s1633_s4, 32 }
  0x72   : > { %p1316_p4 = scmp.lt.s32.totalorder %s1314_s29, %s1310_s23 }
  0x74   : > { %p1317_p7 = por %p1316_p4, %p1315_p3 }
  0x76   : > { %p1318_p8 = pnand %p1317_p7, %p1313_p2 }
  0x93   : > { %v427_v37 = vpop.permute.xlu2 %426 }
  0x98   : > { %v300_v38 = vpop.permute.xlu0 %299  ;;  %v304_v39 = vpop.permute.xlu1 %303 }
  0x99   : > { %v320_v40 = vsel %vm312_vm0, %v304_v39, 0 }
  0x9a   : > { %355 = vmatpush.bf16.msra.mxu2 %v320_v40 }
  0x9b   : > { %v429_v42 = vpop.permute.xlu2 %428 }
  0x9c   : > { %v432_v43 = vsel %vm430_vm2, %v427_v37, %v429_v42  ;;  %v443_v53 = vsel %vm312_vm0, %v429_v42, 0 }
  0x9d   : > { %1161 = vmatmul.msk.bf16.vlgmr.msra.gmra.mxu2 %vm308_vm1, %v1158_v41  ;;  %v440_v44 = vsel %vm312_vm0, %v432_v43, 0 }
  0x9e   : > { %465 = vmatpush.bf16.msrb.mxu3 %v440_v44 }
  0xa0   : > { %v302_v45 = vpop.permute.xlu0 %301 }
  0xa1   : > { %v306_v47 = vsel %vm305_vm3, %v300_v38, %v302_v45  ;;  %v307_v48 = vsel %vm305_vm3, %v302_v45, %v304_v39  ;;  %1167 = vmatmul.msk.bf16.vlgmr.msrb.gmra.mxu3 %vm308_vm1, %v1165_v46  ;;  %v1185_v45 = vld [vmem:[%s1630_s1 + $0x1c] sm:$0xf] }
  0xa2   : > { %v314_v51 = vsel %vm312_vm0, %v306_v47, 0  ;;  %v317_v52 = vsel %vm312_vm0, %v307_v48, 0 }
  0xa3   : > { %329 = vmatpush.bf16.msra.mxu0 %v314_v51  ;;  %342 = vmatpush.bf16.msra.mxu1 %v317_v52  ;;  %v499_v54 = vpop.permute.xlu2 %498 }
  0xa6   : > { %1159 = vmatmul.msk.bf16.vlgmr.msra.gmra.mxu0 %vm308_vm1, %v1158_v41  ;;  %1160 = vmatmul.msk.bf16.vlgmr.msra.gmra.mxu1 %vm308_vm1, %v1158_v41 }
  0xa7   : > { %394 = vmatpush.bf16.msrb.mxu0 %v370_v49  ;;  %407 = vmatpush.bf16.msrb.mxu1 %v372_v50 }
  0xaa   : > { %v425_v55 = vpop.permute.xlu1 %424 }
  0xab   : > { %478 = vmatpush.bf16.msra.mxu0 %v443_v53  ;;  %v431_v56 = vsel %vm430_vm2, %v425_v55, %v427_v37  ;;  %v577_v58 = vpop.permute.xlu2 %576 }
  0xac   : > { %v437_v57 = vsel %vm312_vm0, %v431_v56, 0  ;;  %v591_v0 = vsel %vm312_vm0, %v577_v58, 0 }
  0xad   : > { %452 = vmatpush.bf16.msrb.mxu2 %v437_v57 }
  0xb0   : > { %1166 = vmatmul.msk.bf16.vlgmr.msrb.gmra.mxu2 %vm308_vm1, %v1165_v46 }
  0xb3   : > { %v503_v59 = vpop.permute.xlu1 %502  ;;  %v651_v10 = vpop.permute.xlu2 %650 }
  0xb4   : > { %v517_v60 = vsel %vm312_vm0, %v503_v59, 0  ;;  %v501_v61 = vpop.permute.xlu0 %500  ;;  %v665_v11 = vsel %vm312_vm0, %v651_v10, 0 }
  0xb5   : > { %v506_v62 = vsel %vm504_vm4, %v501_v61, %v503_v59  ;;  %v505_v63 = vsel %vm504_vm4, %v499_v54, %v501_v61  ;;  %552 = vmatpush.bf16.msra.mxu3 %v517_v60 }
  0xb6   : > { %1163 = vmatmul.msk.bf16.vlgmr.msrb.gmra.mxu0 %vm308_vm1, %v288_v36  ;;  %1164 = vmatmul.msk.bf16.vlgmr.msrb.gmra.mxu1 %vm308_vm1, %v288_v36  ;;  %v514_v1 = vsel %vm312_vm0, %v506_v62, 0  ;;  %v511_v2 = vsel %vm312_vm0, %v505_v63, 0  ;;  %v1181_v36 = vld [vmem:[%s1630_s1 + $0x18] sm:$0xf]  ;;  %v383_v47 = vpop.f32.mrf.mxu3 }
  0xb7   : > { %526 = vmatpush.bf16.msra.mxu1 %v511_v2  ;;  %539 = vmatpush.bf16.msra.mxu2 %v514_v1 }
  0xb8   : > { %1172 = vmatmul.msk.bf16.vlgmr.msra.gmra.mxu3 %vm308_vm1, %v1169_v3 }
  0xbb   : > { %626 = vmatpush.bf16.msrb.mxu2 %v591_v0  ;;  %v725_v19 = vpop.permute.xlu2 %724 }
  0xbc   : > { %v575_v4 = vpop.permute.xlu1 %574  ;;  %v739_v28 = vsel %vm312_vm0, %v725_v19, 0 }
  0xbd   : > { %v573_v5 = vpop.permute.xlu0 %572  ;;  %v580_v6 = vsel %vm578_vm5, %v575_v4, %v577_v58 }
  0xbe   : > { %v579_v7 = vsel %vm578_vm5, %v573_v5, %v575_v4  ;;  %v588_v8 = vsel %vm312_vm0, %v580_v6, 0  ;;  %v385_v48 = vpop.f32.mrf.mxu3 }
  0xbf   : > { %v585_v9 = vsel %vm312_vm0, %v579_v7, 0  ;;  %613 = vmatpush.bf16.msrb.mxu1 %v588_v8  ;;  %v232_v48 = vld [vmem:[#allocation2 + $0x88] sm:$0xff] }
  0xc0   : > { %1171 = vmatmul.msk.bf16.vlgmr.msra.gmra.mxu2 %vm308_vm1, %v1169_v3  ;;  %600 = vmatpush.bf16.msrb.mxu0 %v585_v9 }
  0xc3   : > { %v795_v27 = vpop.permute.xlu2 %794 }
  0xc5   : > { %v649_v12 = vpop.permute.xlu1 %648 }
  0xc6   : > { %1168 = vmatmul.msk.bf16.vlgmr.msra.gmra.mxu0 %vm308_vm1, %v1165_v46  ;;  %1170 = vmatmul.msk.bf16.vlgmr.msra.gmra.mxu1 %vm308_vm1, %v1169_v3  ;;  %v647_v13 = vpop.permute.xlu0 %646  ;;  %v654_v14 = vsel %vm652_vm6, %v649_v12, %v651_v10  ;;  %v1189_v46 = vld [vmem:[%s1630_s1 + $0x20] sm:$0xf] }
  0xc7   : > { %v653_v15 = vsel %vm652_vm6, %v647_v13, %v649_v12  ;;  %v662_v16 = vsel %vm312_vm0, %v654_v14, 0  ;;  %700 = vmatpush.bf16.msra.mxu1 %v665_v11  ;;  %v245_v11 = vld [vmem:[#allocation2 + $0xf0] sm:$0xff]  ;;  %v246_v13 = vld [vmem:[#allocation2 + $0xf8] sm:$0xff] }
  0xc8   : > { %v659_v17 = vsel %vm312_vm0, %v653_v15, 0  ;;  %687 = vmatpush.bf16.msra.mxu0 %v662_v16  ;;  %v277_v12 = vld [vmem:[#allocation2 + $0x1f0] sm:$0xff]  ;;  %v278_v14 = vld [vmem:[#allocation2 + $0x1f8] sm:$0xff]  ;;  %v243_v15 = vld [vmem:[#allocation2 + $0xe0] sm:$0xff] }
  0xc9   : > { %674 = vmatpush.bf16.msrb.mxu3 %v659_v17  ;;  %v275_v16 = vld [vmem:[#allocation2 + $0x1e0] sm:$0xff]  ;;  %v244_v17 = vld [vmem:[#allocation2 + $0xe8] sm:$0xff] }
  0xcb   : > { %v873_v37 = vpop.permute.xlu2 %872 }
  0xcc   : > { %1178 = vmatmul.msk.bf16.vlgmr.msrb.gmra.mxu3 %vm308_vm1, %v1177_v18  ;;  %v887_v38 = vsel %vm312_vm0, %v873_v37, 0 }
  0xce   : > { %v723_v21 = vpop.permute.xlu1 %722 }
  0xcf   : > { %v728_v22 = vsel %vm726_vm7, %v723_v21, %v725_v19  ;;  %v721_v23 = vpop.permute.xlu0 %720 }
  0xd0   : > { %1176 = vmatmul.msk.bf16.vlgmr.msrb.gmra.mxu2 %vm308_vm1, %v1173_v20  ;;  %v736_v24 = vsel %vm312_vm0, %v728_v22, 0  ;;  %v727_v25 = vsel %vm726_vm7, %v721_v23, %v723_v21  ;;  %v241_v22 = vld [vmem:[#allocation2 + $0xd0] sm:$0xff] }
  0xd1   : > { %v733_v26 = vsel %vm312_vm0, %v727_v25, 0  ;;  %761 = vmatpush.bf16.msra.mxu3 %v736_v24  ;;  %v273_v23 = vld [vmem:[#allocation2 + $0x1d0] sm:$0xff]  ;;  %v242_v24 = vld [vmem:[#allocation2 + $0xd8] sm:$0xff] }
  0xd2   : > { %748 = vmatpush.bf16.msra.mxu2 %v733_v26  ;;  %v274_v25 = vld [vmem:[#allocation2 + $0x1d8] sm:$0xff]  ;;  %v239_v26 = vld [vmem:[#allocation2 + $0xc0] sm:$0xff] }
  0xd6   : > { %1174 = vmatmul.msk.bf16.vlgmr.msrb.gmra.mxu0 %vm308_vm1, %v1173_v20  ;;  %1175 = vmatmul.msk.bf16.vlgmr.msrb.gmra.mxu1 %vm308_vm1, %v1173_v20  ;;  %v276_v20 = vld [vmem:[#allocation2 + $0x1e8] sm:$0xff] }
  0xd7   : > { %774 = vmatpush.bf16.msrb.mxu0 %v739_v28  ;;  %v799_v29 = vpop.permute.xlu1 %798  ;;  %v240_v28 = vld [vmem:[#allocation2 + $0xc8] sm:$0xff] }
  0xd8   : > { %v813_v30 = vsel %vm312_vm0, %v799_v29, 0  ;;  %v797_v31 = vpop.permute.xlu0 %796 }
  0xd9   : > { %v802_v32 = vsel %vm800_vm8, %v797_v31, %v799_v29  ;;  %v801_v33 = vsel %vm800_vm8, %v795_v27, %v797_v31  ;;  %848 = vmatpush.bf16.msrb.mxu3 %v813_v30  ;;  %v271_v27 = vld [vmem:[#allocation2 + $0x1c0] sm:$0xff]  ;;  %v272_v29 = vld [vmem:[#allocation2 + $0x1c8] sm:$0xff]  ;;  %v237_v30 = vld [vmem:[#allocation2 + $0xb0] sm:$0xff] }
  0xda   : > { %v810_v34 = vsel %vm312_vm0, %v802_v32, 0  ;;  %v807_v35 = vsel %vm312_vm0, %v801_v33, 0  ;;  %v269_v32 = vld [vmem:[#allocation2 + $0x1b0] sm:$0xff]  ;;  %v238_v33 = vld [vmem:[#allocation2 + $0xb8] sm:$0xff] }
  0xdb   : > { %822 = vmatpush.bf16.msrb.mxu1 %v807_v35  ;;  %835 = vmatpush.bf16.msrb.mxu2 %v810_v34  ;;  %v270_v34 = vld [vmem:[#allocation2 + $0x1b8] sm:$0xff]  ;;  %v235_v35 = vld [vmem:[#allocation2 + $0xa0] sm:$0xff] }
  0xdc   : > { %1183 = vmatmul.msk.bf16.vlgmr.msra.gmra.mxu3 %vm308_vm1, %v1181_v36 }
  0xdd   : > { %940 = vmatpush.msra.mxu3 %v245_v11  ;;  %v221_v11 = vld [vmem:[#allocation2 + $0x30] sm:$0xff] }
  0xdf   : > { %941 = vmatpush.msra.mxu3 %v243_v15  ;;  %v254_v15 = vld [vmem:[#allocation2 + $0x138] sm:$0xff] }
  0xe0   : > { %1182 = vmatmul.msk.bf16.vlgmr.msra.gmra.mxu2 %vm308_vm1, %v1181_v36  ;;  %v871_v39 = vpop.permute.xlu1 %870  ;;  %v869_v40 = vpop.permute.xlu0 %868 }
  0xe1   : > { %v876_v41 = vsel %vm874_vm9, %v871_v39, %v873_v37  ;;  %v875_v42 = vsel %vm874_vm9, %v869_v40, %v871_v39  ;;  %922 = vmatpush.bf16.msra.mxu2 %v887_v38  ;;  %942 = vmatpush.msra.mxu3 %v241_v22  ;;  %v236_v37 = vld [vmem:[#allocation2 + $0xa8] sm:$0xff] }
  0xe2   : > { %v884_v43 = vsel %vm312_vm0, %v876_v41, 0  ;;  %v881_v44 = vsel %vm312_vm0, %v875_v42, 0  ;;  %v268_v40 = vld [vmem:[#allocation2 + $0x1a8] sm:$0xff]  ;;  %v233_v42 = vld [vmem:[#allocation2 + $0x90] sm:$0xff] }
  0xe3   : > { %943 = vmatpush.msra.mxu3 %v239_v26  ;;  %v250_v26 = vld [vmem:[#allocation2 + $0x118] sm:$0xff] }
  0xe5   : > { %944 = vmatpush.msra.mxu3 %v237_v30  ;;  %v248_v30 = vld [vmem:[#allocation2 + $0x108] sm:$0xff] }
  0xe6   : > { %1179 = vmatmul.msk.bf16.vlgmr.msra.gmra.mxu0 %vm308_vm1, %v1177_v18  ;;  %1180 = vmatmul.msk.bf16.vlgmr.msra.gmra.mxu1 %vm308_vm1, %v1177_v18 }
  0xe7   : > { %896 = vmatpush.bf16.msra.mxu0 %v881_v44  ;;  %909 = vmatpush.bf16.msra.mxu1 %v884_v43  ;;  %v265_v43 = vld [vmem:[#allocation2 + $0x190] sm:$0xff]  ;;  %v234_v44 = vld [vmem:[#allocation2 + $0x98] sm:$0xff] }
  0xe8   : > { %945 = vmatpush.msra.mxu3 %v235_v35 }
  0xea   : > { %946 = vmatpush.msra.mxu3 %v233_v42  ;;  %v279_v42 = vld [vmem:[#allocation2 + $0x200] sm:$0xff] }
  0xec   : > { %1188 = vmatmul.msk.bf16.vlgmr.msrb.gmra.mxu3 %vm308_vm1, %v1185_v45 }
  0xf0   : > { %1187 = vmatmul.msk.bf16.vlgmr.msrb.gmra.mxu2 %vm308_vm1, %v1185_v45 }
  0xf1   : > { %1000 = vmatpush.msrb.mxu2 %v246_v13  ;;  %v253_v13 = vld [vmem:[#allocation2 + $0x130] sm:$0xff] }
  0xf3   : > { %1001 = vmatpush.msrb.mxu2 %v244_v17  ;;  %v251_v17 = vld [vmem:[#allocation2 + $0x120] sm:$0xff] }
  0xf5   : > { %1002 = vmatpush.msrb.mxu2 %v242_v24  ;;  %v249_v24 = vld [vmem:[#allocation2 + $0x110] sm:$0xff] }
  0xf6   : > { %1184 = vmatmul.msk.bf16.vlgmr.msrb.gmra.mxu0 %vm308_vm1, %v1181_v36  ;;  %1186 = vmatmul.msk.bf16.vlgmr.msrb.gmra.mxu1 %vm308_vm1, %v1185_v45  ;;  %v267_v36 = vld [vmem:[#allocation2 + $0x1a0] sm:$0xff]  ;;  %v266_v45 = vld [vmem:[#allocation2 + $0x198] sm:$0xff] }
  0xf7   : > { %960 = vmatpush.msrb.mxu0 %v277_v12  ;;  %1020 = vmatpush.msrb.mxu1 %v278_v14  ;;  %v222_v14 = vld [vmem:[#allocation2 + $0x38] sm:$0xff] }
  0xf8   : > { %1003 = vmatpush.msrb.mxu2 %v240_v28  ;;  %v247_v28 = vld [vmem:[#allocation2 + $0x100] sm:$0xff] }
  0xf9   : > { %961 = vmatpush.msrb.mxu0 %v275_v16  ;;  %1021 = vmatpush.msrb.mxu1 %v276_v20  ;;  %v219_v16 = vld [vmem:[#allocation2 + $0x20] sm:$0xff] }
  0xfa   : > { %1004 = vmatpush.msrb.mxu2 %v238_v33  ;;  %v285_v33 = vld [vmem:[#allocation2 + $0x230] sm:$0xff] }
  0xfb   : > { %962 = vmatpush.msrb.mxu0 %v273_v23  ;;  %1022 = vmatpush.msrb.mxu1 %v274_v25  ;;  %v217_v23 = vld [vmem:[#allocation2 + $0x10] sm:$0xff]  ;;  %v218_v25 = vld [vmem:[#allocation2 + $0x18] sm:$0xff] }
  0xfc   : > { %1005 = vmatpush.msrb.mxu2 %v236_v37  ;;  %v281_v37 = vld [vmem:[#allocation2 + $0x210] sm:$0xff] }
  0xfd   : > { %963 = vmatpush.msrb.mxu0 %v271_v27  ;;  %1023 = vmatpush.msrb.mxu1 %v272_v29  ;;  %v215_v27 = vld [vmem:[#allocation2] sm:$0xff]  ;;  %v216_v29 = vld [vmem:[#allocation2 + $0x8] sm:$0xff] }
  0xfe   : > { %1006 = vmatpush.msrb.mxu2 %v234_v44  ;;  %v1373_v44 = vmov 0  }
  0xff   : > { %964 = vmatpush.msrb.mxu0 %v269_v32  ;;  %1024 = vmatpush.msrb.mxu1 %v270_v34  ;;  %v283_v34 = vld [vmem:[#allocation2 + $0x220] sm:$0xff] }
 0x100   : > { %1192 = vmatmul.msk.bf16.vlgmr.msra.gmra.mxu2 %vm308_vm1, %v1189_v46  ;;  %1263 = vset.pattern.permute.xlu0 %v1373_v44 }
 0x101   : > { %965 = vmatpush.msrb.mxu0 %v267_v36  ;;  %1025 = vmatpush.msrb.mxu1 %v268_v40 }
 0x102   : > { %1007 = vmatpush.msrb.mxu2 %v232_v48  ;;  %v214_v48 = vld [vmem:[%s1632_s3] sm:$0xff] }
 0x103   : > { %966 = vmatpush.msrb.mxu0 %v265_v43  ;;  %1026 = vmatpush.msrb.mxu1 %v266_v45 }
 0x104   : > { %933 = vperm.xlu0 %1263, %v214_v48  }
 0x106   : > { %1190 = vmatmul.msk.bf16.vlgmr.msra.gmra.mxu0 %vm308_vm1, %v1189_v46  ;;  %1191 = vmatmul.msk.bf16.vlgmr.msra.gmra.mxu1 %vm308_vm1, %v1189_v46  ;;  %v231_v46 = vld [vmem:[#allocation2 + $0x80] sm:$0xff] }
 0x107   : > { %947 = vmatpush.msra.mxu3 %v231_v46 }
 0x120   : > { %v357_v49 = vpop.f32.mrf.mxu2 }
 0x123   : > { %v331_v50 = vpop.f32.mrf.mxu0  ;;  %v344_v51 = vpop.f32.mrf.mxu1 }
 0x124   : > { %v384_v52 = vadd.f32 %v383_v47, %v331_v50  ;;  %v467_v53 = vpop.f32.mrf.mxu3  ;;  %v263_v47 = vld [vmem:[#allocation2 + $0x180] sm:$0xff]  ;;  %v264_v50 = vld [vmem:[#allocation2 + $0x188] sm:$0xff] }
 0x125   : > { %967 = vmatpush.msrb.mxu0 %v263_v47  ;;  %1027 = vmatpush.msrb.mxu1 %v264_v50 }
 0x128   : > { %v359_v54 = vpop.f32.mrf.mxu2 }
 0x129   : > { %v262_v54 = vld [vmem:[#allocation2 + $0x178] sm:$0xff] }
 0x12a   : > { %1028 = vmatpush.msrb.mxu1 %v262_v54 }
 0x12b   : > { %v333_v55 = vpop.f32.mrf.mxu0  ;;  %v346_v56 = vpop.f32.mrf.mxu1 }
 0x12c   : > { %v469_v57 = vpop.f32.mrf.mxu3  ;;  %v227_v55 = vld [vmem:[#allocation2 + $0x60] sm:$0xff] }
 0x12d   : > { %v259_v56 = vld [vmem:[#allocation2 + $0x160] sm:$0xff]  ;;  %v228_v57 = vld [vmem:[#allocation2 + $0x68] sm:$0xff] }
 0x133   : > { %v454_v58 = vpop.f32.mrf.mxu2  ;;  %v396_v59 = vpop.f32.mrf.mxu0 }
 0x134   : > { %v1564_v60 = vadd.f32 %v454_v58, %v384_v52  ;;  %v397_v61 = vadd.f32 %v396_v59, %v344_v51  ;;  %v409_v62 = vpop.f32.mrf.mxu1  ;;  %v229_v51 = vld [vmem:[#allocation2 + $0x70] sm:$0xff] }
 0x135   : > { %v410_v63 = vadd.f32 %v409_v62, %v357_v49  ;;  %v261_v52 = vld [vmem:[#allocation2 + $0x170] sm:$0xff]  ;;  %948 = vmatpush.msra.mxu3 %v229_v51 }
 0x136   : > { %v1566_v0 = vadd.f32 %v467_v53, %v397_v61  ;;  %v230_v53 = vld [vmem:[#allocation2 + $0x78] sm:$0xff]  ;;  %968 = vmatpush.msrb.mxu0 %v261_v52  ;;  %v260_v61 = vld [vmem:[#allocation2 + $0x168] sm:$0xff] }
 0x137   : > { %1008 = vmatpush.msrb.mxu2 %v230_v53  ;;  %949 = vmatpush.msra.mxu3 %v227_v55 }
 0x138   : > { %969 = vmatpush.msrb.mxu0 %v259_v56  ;;  %1029 = vmatpush.msrb.mxu1 %v260_v61 }
 0x139   : > { %1009 = vmatpush.msrb.mxu2 %v228_v57 }
 0x13b   : > { %v456_v1 = vpop.f32.mrf.mxu2  ;;  %v398_v2 = vpop.f32.mrf.mxu0 }
 0x13c   : > { %v411_v3 = vpop.f32.mrf.mxu1  ;;  %v554_v4 = vpop.f32.mrf.mxu3  ;;  %v257_v1 = vld [vmem:[#allocation2 + $0x150] sm:$0xff]  ;;  %v226_v2 = vld [vmem:[#allocation2 + $0x58] sm:$0xff] }
 0x13d   : > { %970 = vmatpush.msrb.mxu0 %v257_v1  ;;  %v258_v3 = vld [vmem:[#allocation2 + $0x158] sm:$0xff]  ;;  %1010 = vmatpush.msrb.mxu2 %v226_v2 }
 0x13e   : > { %1030 = vmatpush.msrb.mxu1 %v258_v3  ;;  %v286_v2 = vld [vmem:[#allocation2 + $0x238] sm:$0xff] }
 0x143   : > { %v1568_v5 = vpop.f32.mrf.mxu2  ;;  %v480_v6 = vpop.f32.mrf.mxu0 }
 0x144   : > { %v486_v7 = vadd.f32 %v480_v6, %v410_v63  ;;  %v1570_v8 = vpop.f32.mrf.mxu1  ;;  %v556_v9 = vpop.f32.mrf.mxu3  ;;  %v225_v63 = vld [vmem:[#allocation2 + $0x50] sm:$0xff]  ;;  %v255_v6 = vld [vmem:[#allocation2 + $0x140] sm:$0xff]  ;;  %v559_v51 = vadd.f32 %v1568_v5, %v1566_v0 }
 0x145   : > { %950 = vmatpush.msra.mxu3 %v225_v63  ;;  %v256_v9 = vld [vmem:[#allocation2 + $0x148] sm:$0xff]  ;;  %971 = vmatpush.msrb.mxu0 %v255_v6  ;;  %v558_v50 = vadd.f32 %v1570_v8, %v1564_v60 }
 0x146   : > { %v1572_v10 = vadd.f32 %v554_v4, %v486_v7  ;;  %v223_v4 = vld [vmem:[#allocation2 + $0x40] sm:$0xff]  ;;  %v224_v7 = vld [vmem:[#allocation2 + $0x48] sm:$0xff]  ;;  %1031 = vmatpush.msrb.mxu1 %v256_v9 }
 0x147   : > { %951 = vmatpush.msra.mxu3 %v223_v4  ;;  %1011 = vmatpush.msrb.mxu2 %v224_v7  ;;  %v282_v4 = vld [vmem:[#allocation2 + $0x218] sm:$0xff]  ;;  %v280_v9 = vld [vmem:[#allocation2 + $0x208] sm:$0xff] }
 0x148   : > { %972 = vmatpush.msrb.mxu0 %v253_v13  ;;  %1032 = vmatpush.msrb.mxu1 %v254_v15 }
 0x149   : > { %952 = vmatpush.msra.mxu3 %v221_v11  ;;  %1012 = vmatpush.msrb.mxu2 %v222_v14 }
 0x14a   : > { %973 = vmatpush.msrb.mxu0 %v251_v17 }
 0x14b   : > { %v543_v18 = vpop.f32.mrf.mxu2  ;;  %v482_v19 = vpop.f32.mrf.mxu0  ;;  %953 = vmatpush.msra.mxu3 %v219_v16 }
 0x14c   : > { %v530_v21 = vpop.f32.mrf.mxu1  ;;  %v220_v18 = vld [vmem:[#allocation2 + $0x28] sm:$0xff]  ;;  %974 = vmatpush.msrb.mxu0 %v249_v24 }
 0x14d   : > { %v252_v21 = vld [vmem:[#allocation2 + $0x128] sm:$0xff]  ;;  %1013 = vmatpush.msrb.mxu2 %v220_v18  ;;  %954 = vmatpush.msra.mxu3 %v217_v23 }
 0x14e   : > { %1033 = vmatpush.msrb.mxu1 %v252_v21  ;;  %975 = vmatpush.msrb.mxu0 %v247_v28 }
 0x14f   : > { %v1574_v31 = vpop.f32.mrf.mxu3  ;;  %1014 = vmatpush.msrb.mxu2 %v218_v25  ;;  %955 = vmatpush.msra.mxu3 %v215_v27 }
 0x150   : > { %1034 = vmatpush.msrb.mxu1 %v250_v26 }
 0x151   : > { %1015 = vmatpush.msrb.mxu2 %v216_v29  ;;  %992 = vmatpush.msrb.mxu3 %v285_v33 }
 0x152   : > { %1035 = vmatpush.msrb.mxu1 %v248_v30 }
 0x153   : > { %v1576_v38 = vpop.f32.mrf.mxu2  ;;  %v1578_v39 = vpop.f32.mrf.mxu0  ;;  %993 = vmatpush.msrb.mxu3 %v283_v34 }
 0x154   : > { %v1580_v41 = vpop.f32.mrf.mxu1  ;;  %v632_v52 = vadd.f32 %v1578_v39, %v558_v50 }
 0x155   : > { %994 = vmatpush.msrb.mxu3 %v281_v37  ;;  %v633_v53 = vadd.f32 %v1580_v41, %v559_v51 }
 0x157   : > { %v678_v49 = vpop.f32.mrf.mxu3  ;;  %995 = vmatpush.msrb.mxu3 %v279_v42 }
 0x15b   : > { %v630_v58 = vpop.f32.mrf.mxu2  ;;  %v604_v59 = vpop.f32.mrf.mxu0 }
 0x15c   : > { %v617_v62 = vpop.f32.mrf.mxu1  ;;  %v706_v58 = vadd.f32 %v1574_v31, %v632_v52  ;;  %v284_v31 = vld [vmem:[#allocation2 + $0x228] sm:$0xff] }
 0x15d   : > { %v634_v62 = vadd.f32 %v1576_v38, %v1572_v10 }
 0x15f   : > { %v1582_v12 = vpop.f32.mrf.mxu3 }
 0x163   : > { %v750_v19 = vpop.f32.mrf.mxu2  ;;  %v689_v20 = vpop.f32.mrf.mxu0 }
 0x164   : > { %v702_v22 = vpop.f32.mrf.mxu1  ;;  %v707_v57 = vadd.f32 %v689_v20, %v633_v53  ;;  %v780_v59 = vadd.f32 %v750_v19, %v706_v58 }
 0x165   : > { %v708_v5 = vadd.f32 %v702_v22, %v634_v62 }
 0x166   : > { %v781_v61 = vadd.f32 %v1582_v12, %v707_v57 }
 0x167   : > { %v765_v32 = vpop.f32.mrf.mxu3 }
 0x16b   : > { %v752_v35 = vpop.f32.mrf.mxu2  ;;  %v691_v36 = vpop.f32.mrf.mxu0 }
 0x16c   : > { %v704_v40 = vpop.f32.mrf.mxu1 }
 0x16f   : > { %v850_v43 = vpop.f32.mrf.mxu3 }
 0x173   : > { %v837_v45 = vpop.f32.mrf.mxu2  ;;  %v776_v46 = vpop.f32.mrf.mxu0 }
 0x174   : > { %v824_v47 = vpop.f32.mrf.mxu1  ;;  %v855_v8 = vadd.f32 %v837_v45, %v781_v61  ;;  %v782_v3 = vadd.f32 %v776_v46, %v708_v5 }
 0x175   : > { %v854_v60 = vadd.f32 %v824_v47, %v780_v59 }
 0x176   : > { %v856_v6 = vadd.f32 %v850_v43, %v782_v3  ;;  %v934_v13 = vpop.permute.xlu0 %933 }
 0x177   : > { %v852_v49 = vpop.f32.mrf.mxu3 }
 0x17b   : > { %v839_v54 = vpop.f32.mrf.mxu2  ;;  %v778_v55 = vpop.f32.mrf.mxu0 }
 0x17c   : > { %v826_v56 = vpop.f32.mrf.mxu1 }
 0x183   : > { %v924_v63 = vpop.f32.mrf.mxu2  ;;  %v898_v0 = vpop.f32.mrf.mxu0 }
 0x184   : > { %v928_v39 = vadd.f32 %v898_v0, %v854_v60  ;;  %v911_v1 = vpop.f32.mrf.mxu1  ;;  %v930_v7 = vadd.f32 %v924_v63, %v856_v6 }
 0x185   : > { %v929_v41 = vadd.f32 %v911_v1, %v855_v8 }
 0x186   : > { %956 = vmatmul.f32.vlgmr.msra.gmra.mxu3 %v928_v39  ;;  %1016 = vmatmul.f32.vlgmr.msrb.gmra.mxu2 %v928_v39 }
 0x187   : > { %976 = vmatmul.f32.vlgmr.msrb.gmra.mxu0 %v929_v41  ;;  %1036 = vmatmul.f32.vlgmr.msrb.gmra.mxu1 %v929_v41 }
 0x188   : > { %1052 = vmatpush.msra.mxu3 %v286_v2 }
 0x18a   : > { %1053 = vmatpush.msra.mxu3 %v284_v31 }
 0x18b   : > { %v900_v10 = vpop.f32.mrf.mxu0  ;;  %v926_v38 = vpop.f32.mrf.mxu2 }
 0x18c   : > { %1054 = vmatpush.msra.mxu3 %v282_v4  ;;  %v913_v11 = vpop.f32.mrf.mxu1 }
 0x18e   : > { %1193 = vmatmul.msk.f32.vlgmr.msrb.gmra.mxu3 %vm936_vm10, %v930_v7 }
 0x18f   : > { %1055 = vmatpush.msra.mxu3 %v280_v9 }
 0x196   : > { %1194 = vmatmul.msk.f32.vlgmr.msra.gmra.mxu3 %vm936_vm10, %v930_v7 }
 0x204   : > { %v977_v15 = vpop.f32.mrf.mxu0  ;;  %v1037_v21 = vpop.f32.mrf.mxu1 }
 0x209   : > { %v957_v12 = vpop.f32.mrf.mxu3  ;;  %v1017_v17 = vpop.f32.mrf.mxu2 }
 0x20a   : > { %v958_v14 = vadd.f32 %v957_v12, %v934_v13  ;;  %v1018_v20 = vadd.f32 %v1017_v17, %v934_v13 }
 0x20c   : > { %v978_v16 = vadd.f32 %v977_v15, %v958_v14  ;;  %v1038_v22 = vadd.f32 %v1037_v21, %v1018_v20 }
 0x211   : > { %v997_v18 = vpop.f32.mrf.mxu3 }
 0x212   : > { %v998_v19 = vadd.f32 %v997_v18, %v978_v16 }
 0x214   : > { %1060 = vst [vmem:[%s207_s10] sm:$0xff] %v998_v19 }
 0x219   : > { %v1057_v23 = vpop.f32.mrf.mxu3 }
 0x21a   : > { %v1058_v24 = vadd.f32 %v1057_v23, %v1038_v22 }
 0x21c   : > { %1061 = vst [vmem:[%s207_s10 + $0x8] sm:$0xff] %v1058_v24 }
 0x21d   : > { %1321 = shalt.err (!%p1318_p8)
}
 0x21e   : > { %1206 = dma.vmem_to_hbm [thread:$0]  (%p1437_p5), %s1077_s14, 256, %s1079_s20, %s1063_s22  }
 0x21f PF: > { %p1218_p9 = scmp.ge.s32.totalorder %s1360_s18, 2  ;;  %s1090_s6 = sand.u32 1, %s1348_s15  }
 0x220   : > { %s1091_s7 = scalar_lea.sflag [#allocation4], %s1090_s6 }
 0x221   : > { %p1213_p10 = pnand %p1218_p9, %p1441_p6 }
 0x223   : > { %p1214_p11 = pneg %p1213_p10 }
 0x225   : > { %1343 = dma.done.wait (%p1214_p11), %s1091_s7, 256  }
 0x226   : > { %1345 = vsyncadd (%p1214_p11), %s1091_s7, 4294967040  ;;  %p15_p12 = scmp.ge.s32.totalorder %s1424_s21, 4   ;;  %s1636_s15 = smov %s1352_s16 }
 0x227   : > { %s1637_s16 = smov %s1356_s17  ;;  %s1638_s17 = smov %s1435_s24 }
 0x228   : > { %s1639_s18 = smov %s1424_s21  ;;  %17 = sbr.rel (!%p15_p12) target bundleno = 4 (0x4), region = 84 }
 0x22d   :  { %1097 = vsyncpa [#allocation3], 1 }
 0x22e   :  { %1099 = vsyncpa [#allocation3 + $0x1], 1 }
 0x22f   :  { %1100 = vsyncpa [#allocation4], 1 }
 0x230   :  { %1102 = vsyncpa [#allocation4 + $0x1], 1 }

</bundles_post_ra>
